<compile_context>
chip_gen: v7x
topology: tpu7x:2x2x1
jax: 0.10.0
libtpu: 0.0.40
codegen_flags: <defaults>
</compile_context>

<pallas_src>
import jax
import jax.numpy as jnp
from jax.experimental import pallas as pl
from jax.experimental.pallas import tpu as pltpu

LANES = 128
VMEM_LIMIT = 32 * 1024 * 1024


# --------------------------------------------------------------------------- #
# Kernel 1: projection prologue (gridded over src-row tiles)
# --------------------------------------------------------------------------- #
def _make_project_kernel():
    def project_kernel(x_ref, w_ref, wl_ref, feat_ref, elt_ref):
        x = x_ref[...]                                               # (tile_s, F_in)
        # feat = x @ W  (MXU)
        feat_ref[...] = jnp.dot(x, w_ref[...],
                                preferred_element_type=jnp.float32)  # (tile_s, H*D)
        # left attention logits for all heads in one MXU matmul, then a single
        # (tile_s, 128) -> (128, tile_s) transpose so the main kernel can read
        # lane-dense (1, N_src) rows per head.
        el = jnp.dot(x, wl_ref[...],
                     preferred_element_type=jnp.float32)             # (tile_s, 128)
        elt_ref[...] = jnp.transpose(el)                             # (128, tile_s)
    return project_kernel


# --------------------------------------------------------------------------- #
# Kernel 2: edge-softmax + aggregation (gridded over dst-node tiles)
# --------------------------------------------------------------------------- #
def _make_agg_kernel(tile_d, n_src, num_heads, out_feats, negative_slope):
    def agg_kernel(adj_ref, feat_ref, featd_ref, elt_ref, arbd_ref, bias_ref, o_ref):
        mask = adj_ref[...] > 0                                      # (tile_d, n_src)
        feat = feat_ref[...]                                         # (n_src, H*D) resident
        # right attention logits for this dst tile, all heads batched in one MXU matmul
        er_all = jnp.dot(featd_ref[...], arbd_ref[...],
                         preferred_element_type=jnp.float32)         # (tile_d, 8)

        acc = jnp.zeros((tile_d, out_feats), jnp.float32)
        for h in range(num_heads):                                   # static unroll
            # lane-dense (tile_d, n_src) logits: (1, n_src) row + (tile_d, 1) column
            e = elt_ref[h:h + 1, :] + er_all[:, h:h + 1]
            e = jnp.where(e > 0, e, negative_slope * e)              # LeakyReLU
            e = jnp.where(mask, e, jnp.float32(-1e30))               # mask non-edges
            m = jnp.max(e, axis=-1, keepdims=True)                   # (tile_d, 1)
            p = jnp.where(mask, jnp.exp(e - m), 0.0)                 # un-normalized
            denom = jnp.sum(p, axis=-1, keepdims=True)               # (tile_d, 1)
            # zero in-degree -> denom==0 -> p==0 -> head==0 -> zero output row.
            inv = pl.reciprocal(jnp.maximum(denom, jnp.float32(1e-9)), approx=True)
            # aggregation matmul on un-normalized weights; normalize the small
            # (tile_d, D) result afterwards (no (tile_d, n_src) divide).
            head = jnp.dot(p, feat[:, h * out_feats:(h + 1) * out_feats],
                           preferred_element_type=jnp.float32)       # (tile_d, D)
            acc = acc + head * inv

        # mean over heads + hoisted mean-bias + ReLU activation
        res = acc * jnp.float32(1.0 / num_heads) + bias_ref[...]
        o_ref[...] = jnp.maximum(res, 0.0)
    return agg_kernel


# --------------------------------------------------------------------------- #
# Wrapper
# --------------------------------------------------------------------------- #
def gat_forward(x, adj, w, attn_l, attn_r, bias, *, num_heads, out_feats,
                negative_slope=0.2, tile_d=128, tile_s=128):
    n_src, f_in = x.shape
    n_dst = adj.shape[0]
    hd = num_heads * out_feats
    hp_l = LANES                      # padded head axis for the transposed el logits
    hp_r = max(8, num_heads)          # padded head axis for the er block-diag matmul

    tile_s = min(tile_s, n_src)
    tile_d = min(tile_d, n_dst)
    assert n_src % tile_s == 0 and n_dst % tile_d == 0
    assert n_dst <= n_src             # dst nodes are a prefix of the src nodes

    # ---- weight plumbing (pure layout / tiny XLA ops) ----
    w3 = w.reshape(f_in, num_heads, out_feats)
    wl = jnp.einsum("fhd,hd->fh", w3, attn_l)                        # (F_in, H)
    wl_pad = jnp.zeros((f_in, hp_l), jnp.float32).at[:, :num_heads].set(wl)
    ar_bd = jnp.zeros((hd, hp_r), jnp.float32)
    for h in range(num_heads):
        ar_bd = ar_bd.at[h * out_feats:(h + 1) * out_feats, h].set(attn_r[h])
    bias_mean = jnp.mean(bias, axis=0, keepdims=True)                # (1, D)
    # adj only feeds the edge mask; bf16 halves the O(N^2) HBM/VMEM footprint.
    adj_bf16 = adj.astype(jnp.bfloat16)

    # ---- kernel 1: projection (grid over src tiles) ----
    n_s_tiles = n_src // tile_s
    feat, el_t = pl.pallas_call(
        _make_project_kernel(),
        out_shape=(jax.ShapeDtypeStruct((n_src, hd), jnp.float32),
                   jax.ShapeDtypeStruct((hp_l, n_src), jnp.float32)),
        grid=(n_s_tiles,),
        in_specs=[pl.BlockSpec((tile_s, f_in), lambda s: (s, 0)),
                  pl.BlockSpec((f_in, hd), lambda s: (0, 0)),
                  pl.BlockSpec((f_in, hp_l), lambda s: (0, 0))],
        out_specs=(pl.BlockSpec((tile_s, hd), lambda s: (s, 0)),
                   pl.BlockSpec((hp_l, tile_s), lambda s: (0, s))),
        compiler_params=pltpu.CompilerParams(
            dimension_semantics=("parallel",),
            vmem_limit_bytes=VMEM_LIMIT),
        cost_estimate=pl.CostEstimate(
            flops=2 * n_src * f_in * (hd + hp_l),
            transcendentals=0,
            bytes_accessed=4 * (n_src * f_in + f_in * (hd + hp_l)
                                + n_src * hd + hp_l * n_src)),
    )(x, w, wl_pad)

    # ---- kernel 2: edge-softmax + aggregation (grid over dst tiles) ----
    n_d_tiles = n_dst // tile_d
    out = pl.pallas_call(
        _make_agg_kernel(tile_d, n_src, num_heads, out_feats, negative_slope),
        out_shape=jax.ShapeDtypeStruct((n_dst, out_feats), jnp.float32),
        grid=(n_d_tiles,),
        in_specs=[
            pl.BlockSpec((tile_d, n_src), lambda i: (i, 0)),   # adj tile (bf16)
            pl.BlockSpec((n_src, hd), lambda i: (0, 0)),       # feat (VMEM-resident)
            pl.BlockSpec((tile_d, hd), lambda i: (i, 0)),      # feat rows of this dst tile
            pl.BlockSpec((hp_l, n_src), lambda i: (0, 0)),     # el_t (VMEM-resident)
            pl.BlockSpec((hd, hp_r), lambda i: (0, 0)),        # attn_r block-diag
            pl.BlockSpec((1, out_feats), lambda i: (0, 0)),    # hoisted mean bias
        ],
        out_specs=pl.BlockSpec((tile_d, out_feats), lambda i: (i, 0)),
        compiler_params=pltpu.CompilerParams(
            dimension_semantics=("parallel",),                 # megacore on v7x
            vmem_limit_bytes=VMEM_LIMIT),
        cost_estimate=pl.CostEstimate(
            flops=2 * n_dst * hd * hp_r
                  + 2 * num_heads * n_dst * n_src * out_feats
                  + 8 * num_heads * n_dst * n_src,
            transcendentals=num_heads * n_dst * n_src,
            bytes_accessed=2 * n_dst * n_src
                           + 4 * (n_src * hd + n_dst * hd + hp_l * n_src
                                  + n_dst * out_feats)),
    )(adj_bf16, feat, feat, el_t, ar_bd, bias_mean)
    return out


# --------------------------------------------------------------------------- #
# Pure-JAX reference (for correctness check only)
# --------------------------------------------------------------------------- #
def gat_reference(x, adj, w, attn_l, attn_r, bias, *, num_heads, out_feats,
                  negative_slope=0.2):
    n_src = x.shape[0]
    n_dst = adj.shape[0]
    feat = (x @ w).reshape(n_src, num_heads, out_feats)
    el = jnp.einsum("shd,hd->sh", feat, attn_l)                      # (Ns, H)
    er = jnp.einsum("shd,hd->sh", feat[:n_dst], attn_r)              # (Nd, H)
    e = el[None, :, :] + er[:, None, :]                              # (Nd, Ns, H)
    e = jnp.where(e > 0, e, negative_slope * e)
    mask = (adj > 0)[:, :, None]
    e = jnp.where(mask, e, -1e30)
    m = jnp.max(e, axis=1, keepdims=True)
    p = jnp.where(mask, jnp.exp(e - m), 0.0)
    denom = jnp.sum(p, axis=1, keepdims=True)
    alpha = p / jnp.maximum(denom, 1e-9)
    out = jnp.einsum("dsh,shk->dhk", alpha, feat) + bias[None, :, :]
    return jnp.maximum(out.mean(axis=1), 0.0)


if __name__ == "__main__":
    # Small shapes consistent with a 1-layer GAT block (dst nodes = first n_dst src).
    in_feats, n_classes, num_heads = 64, 8, 4
    n_src, n_dst = 512, 256

    key = jax.random.PRNGKey(0)
    k_x, k_w, k_al, k_ar, k_b, k_adj = jax.random.split(key, 6)

    x = jax.random.normal(k_x, (n_src, in_feats), jnp.float32)
    w = jax.random.normal(k_w, (in_feats, num_heads * n_classes), jnp.float32)
    w = w * (1.0 / jnp.sqrt(jnp.float32(in_feats)))
    attn_l = jax.random.normal(k_al, (num_heads, n_classes), jnp.float32) * 0.1
    attn_r = jax.random.normal(k_ar, (num_heads, n_classes), jnp.float32) * 0.1
    bias = jax.random.normal(k_b, (num_heads, n_classes), jnp.float32) * 0.1

    # Random bipartite block adjacency + self-edges so every dst has >= 1 neighbor.
    adj = (jax.random.uniform(k_adj, (n_dst, n_src)) < 0.15).astype(jnp.float32)
    adj = jnp.maximum(adj, jnp.eye(n_dst, n_src, dtype=jnp.float32))

    out = gat_forward(x, adj, w, attn_l, attn_r, bias,
                      num_heads=num_heads, out_feats=n_classes)
    out = jax.block_until_ready(out)
    assert out.shape == (n_dst, n_classes)

    ref = gat_reference(x, adj, w, attn_l, attn_r, bias,
                        num_heads=num_heads, out_feats=n_classes)
    err = float(jnp.max(jnp.abs(out - ref)))
    assert err < 2e-2, f"max abs error too large: {err}"
    print("KERNEL_OK")
</pallas_src>

<mosaic_0001>
module attributes {stable_mosaic.version = 11 : i64} {
  func.func @project_kernel(%arg0: i32, %arg1: memref<128x64xf32, #tpu.memory_space<vmem>>, %arg2: memref<64x32xf32, #tpu.memory_space<vmem>>, %arg3: memref<64x128xf32, #tpu.memory_space<vmem>>, %arg4: memref<128x32xf32, #tpu.memory_space<vmem>>, %arg5: memref<128x128xf32, #tpu.memory_space<vmem>>) attributes {dimension_semantics = [#tpu.dimension_semantics<parallel>], iteration_bounds = array<i64: 4>, scalar_prefetch = 0 : i64, scratch_operands = 0 : i64, tpu.core_type = #tpu.core_type<tc>, window_params = [{transform_indices = @transform_0, window_bounds = array<i64: 128, 64>}, {pipeline_mode = #tpu.pipeline_mode<synchronous>, transform_indices = @transform_1, window_bounds = array<i64: 64, 32>}, {pipeline_mode = #tpu.pipeline_mode<synchronous>, transform_indices = @transform_2, window_bounds = array<i64: 64, 128>}, {transform_indices = @transform_3, window_bounds = array<i64: 128, 32>}, {transform_indices = @transform_4, window_bounds = array<i64: 128, 128>}]} {
    %c0 = arith.constant 0 : index
    %c0_0 = arith.constant 0 : index
    %0 = vector.load %arg1[%c0, %c0_0] : memref<128x64xf32, #tpu.memory_space<vmem>>, vector<128x64xf32>
    %c0_1 = arith.constant 0 : index
    %c0_2 = arith.constant 0 : index
    %1 = vector.load %arg2[%c0_1, %c0_2] : memref<64x32xf32, #tpu.memory_space<vmem>>, vector<64x32xf32>
    %cst = arith.constant dense<0.000000e+00> : vector<128x32xf32>
    %2 = tpu.matmul %0, %1, %cst {dimension_numbers = #tpu.dot_dimension_numbers<[1], [0], [0], [1], [0, 0, 1, 1], [], []>} : vector<128x64xf32>, vector<64x32xf32>, vector<128x32xf32> -> vector<128x32xf32>
    %c0_3 = arith.constant 0 : index
    %c0_4 = arith.constant 0 : index
    %3 = vector.load %arg4[%c0_3, %c0_4] : memref<128x32xf32, #tpu.memory_space<vmem>>, vector<128x32xf32>
    tpu.vector_store %arg4[%c0_3, %c0_4], %2 {strides = array<i32>} : memref<128x32xf32, #tpu.memory_space<vmem>>, vector<128x32xf32>,
    %c0_5 = arith.constant 0 : index
    %c0_6 = arith.constant 0 : index
    %4 = vector.load %arg3[%c0_5, %c0_6] : memref<64x128xf32, #tpu.memory_space<vmem>>, vector<64x128xf32>
    %cst_7 = arith.constant dense<0.000000e+00> : vector<128x128xf32>
    %5 = tpu.matmul %0, %4, %cst_7 {dimension_numbers = #tpu.dot_dimension_numbers<[1], [0], [0], [1], [0, 0, 1, 1], [], []>} : vector<128x64xf32>, vector<64x128xf32>, vector<128x128xf32> -> vector<128x128xf32>
    %6 = tpu.transpose %5, [1, 0] : vector<128x128xf32> -> vector<128x128xf32>
    %c0_8 = arith.constant 0 : index
    %c0_9 = arith.constant 0 : index
    %7 = vector.load %arg5[%c0_8, %c0_9] : memref<128x128xf32, #tpu.memory_space<vmem>>, vector<128x128xf32>
    tpu.vector_store %arg5[%c0_8, %c0_9], %6 {strides = array<i32>} : memref<128x128xf32, #tpu.memory_space<vmem>>, vector<128x128xf32>,
    return
  }
  func.func @transform_0(%arg0: i32) -> (i32, i32) {
    %c0_i32 = arith.constant 0 : i32
    %c0_i32_0 = arith.constant 0 : i32
    return %arg0, %c0_i32 : i32, i32
  }
  func.func @transform_1(%arg0: i32) -> (i32, i32) {
    %c0_i32 = arith.constant 0 : i32
    %c0_i32_0 = arith.constant 0 : i32
    %c0_i32_1 = arith.constant 0 : i32
    return %c0_i32, %c0_i32_0 : i32, i32
  }
  func.func @transform_2(%arg0: i32) -> (i32, i32) {
    %c0_i32 = arith.constant 0 : i32
    %c0_i32_0 = arith.constant 0 : i32
    %c0_i32_1 = arith.constant 0 : i32
    return %c0_i32, %c0_i32_0 : i32, i32
  }
  func.func @transform_3(%arg0: i32) -> (i32, i32) {
    %c0_i32 = arith.constant 0 : i32
    %c0_i32_0 = arith.constant 0 : i32
    return %arg0, %c0_i32 : i32, i32
  }
  func.func @transform_4(%arg0: i32) -> (i32, i32) {
    %c0_i32 = arith.constant 0 : i32
    %c0_i32_0 = arith.constant 0 : i32
    return %c0_i32, %arg0 : i32, i32
  }
}

</mosaic_0001>

<bundles_post_ra>
// kernel: tpu_custom_call.1
= control target key start
LH: loop header
LB: loop body
LE: loop exit
PB: predicated region body
PF: predicated region fallthrough
CT: control target
= control target key end

     0   :  { %10 = vsyncpa [#allocation3], 0  ;;  %s1364_s0 = inlined_call_operand.vmem [shape: f32[512,64], index: 0, kind: input, shape index: {}]   ;;  %s1365_s1 = inlined_call_operand.vmem [shape: f32[64,32], index: 1, kind: input, shape index: {}]   ;;  %s1366_s2 = inlined_call_operand.vmem [shape: f32[64,128], index: 2, kind: input, shape index: {}]   ;;  %s1367_s3 = inlined_call_operand.vmem [shape: f32[512,32], index: 3, kind: output, shape index: {0}]   ;;  %s1368_s4 = inlined_call_operand.hbm [shape: f32[128,512], index: 4, kind: output, shape index: {1}]  }
   0x1   :  { %12 = vsyncpa [#allocation3 + $0x1], 0  ;;  %s1097_s15 = smov 0   ;;  %s1099_s16 = smov 0  }
   0x2   :  { %s1101_s17 = smov 0   ;;  %s1103_s18 = smov 0  }
   0x3 LB: > { %s1118_s19 = sadd.s32 4294967295, %s1066_s18   ;;  %s757_s20 = sadd.s32 4294967294, %s1066_s18   ;;  %s1066_s18 = sphi %s1103_s18, %s1374_s18   ;;  %s1062_s17 = sphi %s1101_s17, %s1373_s17   ;;  %s1058_s16 = sphi %s1099_s16, %s1372_s16   ;;  %s1054_s15 = sphi %s1097_s15, %s1371_s15  }
   0x4   : > { %s1122_s21 = sadd.s32 1, %s1066_s18   ;;  %s119_s22 = sadd.s32 1, %s1062_s17 }
   0x5   : > { %s116_s23 = ssub.s32 %s1066_s18, %s1122_s21  ;;  %p129_p0 = scmp.ne.s32.totalorder %s1062_s17, %s1058_s16 }
   0x6   : > { %p117_p1 = scmp.eq.s32.totalorder %s116_s23, 0  ;;  %p130_p2 = scmp.eq.s32.totalorder %s1118_s19, 3 }
   0x7   : > { %p135_p3 = scmp.ne.s32.totalorder %s1058_s16, %s1054_s15  ;;  %p136_p4 = scmp.eq.s32.totalorder %s757_s20, 3 }
   0x8   : > { %s1133_s24 = scalar_select %p117_p1, %s1062_s17, %s119_s22  }
   0x9   : > { %p1135_p5 = por %p130_p2, %p129_p0  ;;  %p1139_p6 = por %p136_p4, %p135_p3 }
   0xa   : > { %p760_p7 = scmp.ge.s32.totalorder %s1066_s18, 1  ;;  %p169_p8 = scmp.lt.s32.totalorder %s1066_s18, 5 }
   0xc   : > { %p170_p9 = pnand %p760_p7, %p169_p8 }
   0xd   : > { %v447_v0 = vld [vmem:[%s1366_s2] sm:$0xff] (!%p170_p9)  ;;  %v448_v1 = vld [vmem:[%s1366_s2 + $0x8] sm:$0xff] (!%p170_p9)  ;;  %v449_v2 = vld [vmem:[%s1366_s2 + $0x10] sm:$0xff] (!%p170_p9)  ;;  %s762_s7 = sshll.u32 (!%p170_p9), %s1118_s19, 4  ;;  %vm236_vm0 = vcmask (!%p170_p9), 523264   ;;  %vm430_vm1 = vcmask (!%p170_p9), 261120  }
   0xe   : > { %173 = sbr.rel (%p170_p9) target bundleno = 451 (0x1c3), region = 32  ;;  %v946_v3 = vpack.c.bf16 (!%p170_p9), %v448_v1, %v447_v0  ;;  %v450_v4 = vld [vmem:[%s1366_s2 + $0x18] sm:$0xff] (!%p170_p9)  ;;  %p201_p10 = scmp.lt.s32.totalorder (!%p170_p9), %s762_s7, 63  ;;  %v451_v6 = vld [vmem:[%s1366_s2 + $0x20] sm:$0xff] (!%p170_p9)  ;;  %v452_v7 = vld [vmem:[%s1366_s2 + $0x28] sm:$0xff] (!%p170_p9) }
   0xf   : > { %v950_v5 = vpack.c.bf16 (!%p170_p9), %v450_v4, %v449_v2  ;;  %v228_v8 = vld [vmem:[%s1365_s1] sm:$0xff] (!%p170_p9)  ;;  %v229_v9 = vld [vmem:[%s1365_s1 + $0x8] sm:$0xff] (!%p170_p9)  ;;  %v230_v10 = vld [vmem:[%s1365_s1 + $0x10] sm:$0xff] (!%p170_p9)  ;;  %v954_v13 = vpack.c.bf16 (!%p170_p9), %v452_v7, %v451_v6  ;;  %s799_s11 = sshll.u32 (!%p170_p9), %s1118_s19, 7  ;;  %s1068_s19 = smov (!%p170_p9), [#allocation2]  }
  0x10   : > { %947 = vmatprep.subr.bf16.mxu1 (!%p170_p9), %v946_v3  ;;  %v231_v11 = vld [vmem:[%s1365_s1 + $0x18] sm:$0xff] (!%p170_p9)  ;;  %v930_v12 = vpack.c.bf16 (!%p170_p9), %v229_v9, %v228_v8  ;;  %v232_v15 = vld [vmem:[%s1365_s1 + $0x20] sm:$0xff] (!%p170_p9)  ;;  %v233_v16 = vld [vmem:[%s1365_s1 + $0x28] sm:$0xff] (!%p170_p9)  ;;  %s1316_s20 = scalar_lea.hbm (!%p170_p9), %s1368_s4, %s799_s11  ;;  %s1008_s27 = sshll.u32 (!%p170_p9), %s1068_s19, 4  ;;  %s1009_s27 = int_to_ptr.vmem [resolvable:$false] %s1008_s27 }
  0x11   : > { %949 = vmatpush3.bf16.msra.mxu1 (!%p170_p9), %v946_v3  ;;  %v934_v14 = vpack.c.bf16 (!%p170_p9), %v231_v11, %v230_v10  ;;  %v453_v17 = vld [vmem:[%s1366_s2 + $0x30] sm:$0xff] (!%p170_p9)  ;;  %v454_v18 = vld [vmem:[%s1366_s2 + $0x38] sm:$0xff] (!%p170_p9)  ;;  %v938_v20 = vpack.c.bf16 (!%p170_p9), %v233_v16, %v232_v15  ;;  %s1010_s28 = scalar_lea.vmem (!%p170_p9), %s1009_s27, 4096 }
  0x12   : > { %951 = vmatprep.subr.bf16.mxu1 (!%p170_p9), %v950_v5  ;;  %931 = vmatprep.subr.bf16.mxu0 (!%p170_p9), %v930_v12  ;;  %v958_v21 = vpack.c.bf16 (!%p170_p9), %v454_v18, %v453_v17  ;;  %v234_v22 = vld [vmem:[%s1365_s1 + $0x30] sm:$0xff] (!%p170_p9)  ;;  %v235_v23 = vld [vmem:[%s1365_s1 + $0x38] sm:$0xff] (!%p170_p9) }
  0x13   : > { %933 = vmatpush3.bf16.msra.mxu0 (!%p170_p9), %v930_v12  ;;  %v942_v24 = vpack.c.bf16 (!%p170_p9), %v235_v23, %v234_v22 }
  0x14   : > { %935 = vmatprep.subr.bf16.mxu0 (!%p170_p9), %v934_v14 }
  0x15   : > { %s1376_s7 = smov (!%p201_p10, %s762_s7), 63  ;;  %953 = vmatpush3.bf16.msra.mxu1 %v950_v5 }
  0x16   : > { %s763_s5 = sshll.u32 %s1376_s7, 3  ;;  %955 = vmatprep.subr.bf16.mxu1 %v954_v13  ;;  %s197_s7 = sand.u32 1, %s1058_s16  }
  0x17   : > { %s1196_s23 = scalar_lea.vmem %s1364_s0, %s763_s5  ;;  %937 = vmatpush3.bf16.msra.mxu0 %v934_v14  ;;  %s1257_s9 = scalar_lea.vmem %s1367_s3, %s763_s5 }
  0x18   : > { %v212_v19 = vld [vmem:[%s1196_s23] sm:$0xff]  ;;  %939 = vmatprep.subr.bf16.mxu0 %v938_v20  ;;  %v213_v25 = vld [vmem:[%s1196_s23 + $0x8] sm:$0xff]  ;;  %v214_v26 = vld [vmem:[%s1196_s23 + $0x10] sm:$0xff]  ;;  %s761_s5 = sshll.u32 %s197_s7, 7  ;;  %s1323_s22 = scalar_lea.sflag [#allocation3], %s197_s7 }
  0x19   : > { %906 = vmatprep.mubr.msk.f32.mxu1 %vm236_vm0, %v212_v19  ;;  %866 = vmatprep.mubr.msk.f32.mxu0 %vm236_vm0, %v212_v19  ;;  %v215_v27 = vld [vmem:[%s1196_s23 + $0x18] sm:$0xff]  ;;  %v216_v28 = vld [vmem:[%s1196_s23 + $0x20] sm:$0xff]  ;;  %v217_v29 = vld [vmem:[%s1196_s23 + $0x28] sm:$0xff]  ;;  %s1294_s10 = scalar_lea.vmem [#allocation2], %s761_s5 }
  0x1a   : > { %957 = vmatpush3.bf16.msra.mxu1 %v954_v13  ;;  %v218_v30 = vld [vmem:[%s1196_s23 + $0x30] sm:$0xff]  ;;  %v219_v31 = vld [vmem:[%s1196_s23 + $0x38] sm:$0xff]  ;;  %v220_v32 = vld [vmem:[%s1196_s23 + $0x40] sm:$0xff]  ;;  %s670_s12 = sshll.u32 %s1294_s10, 4  ;;  %s1318_s12 = int_to_ptr.vmem [resolvable:$true] %s670_s12 }
  0x1b   : > { %959 = vmatprep.subr.bf16.mxu1 %v958_v21  ;;  %941 = vmatpush3.bf16.msra.mxu0 %v938_v20  ;;  %v221_v33 = vld [vmem:[%s1196_s23 + $0x48] sm:$0xff]  ;;  %v222_v34 = vld [vmem:[%s1196_s23 + $0x50] sm:$0xff]  ;;  %v223_v35 = vld [vmem:[%s1196_s23 + $0x58] sm:$0xff]  ;;  %p1011_p0 = scmp.lt.s32.totalorder %s1318_s12, %s1009_s27 }
  0x1c   : > { %943 = vmatprep.subr.bf16.mxu0 %v942_v24  ;;  %v224_v36 = vld [vmem:[%s1196_s23 + $0x60] sm:$0xff]  ;;  %v225_v37 = vld [vmem:[%s1196_s23 + $0x68] sm:$0xff]  ;;  %v226_v38 = vld [vmem:[%s1196_s23 + $0x70] sm:$0xff] }
  0x1d   : > { %v227_v39 = vld [vmem:[%s1196_s23 + $0x78] sm:$0xff]  ;;  %s1004_s23 = scalar_lea.vmem %s1318_s12, 2048 }
  0x1e   : > { %961 = vmatpush3.bf16.msra.mxu1 %v958_v21  ;;  %p1005_p11 = scmp.ne.s32.totalorder %s1318_s12, %s1004_s23  ;;  %p1012_p1 = scmp.lt.s32.totalorder %s1010_s28, %s1004_s23 }
  0x1f   : > { %945 = vmatpush3.bf16.msra.mxu0 %v942_v24 }
  0x20   : > { %p1006_p12 = pnand %p1005_p11, %p1135_p5  ;;  %p1013_p2 = por %p1012_p1, %p1011_p0 }
  0x21   : > { %907 = vmatmul.mubr.msk.f32.vlgmr.msra.gmra.mrb[0].mxu1 %vm236_vm0, %v213_v25 }
  0x22   : > { %909 = vmatprep.mubr.msk.f32.mxu1 %vm236_vm0, %v214_v26  ;;  %867 = vmatmul.mubr.msk.f32.vlgmr.msra.gmra.mrb[0].mxu0 %vm236_vm0, %v213_v25  ;;  %p1007_p13 = pneg %p1006_p12 }
  0x23   : > { %869 = vmatprep.mubr.msk.f32.mxu0 %vm236_vm0, %v214_v26 }
  0x24   : > { %p1014_p3 = pnand %p1013_p2, %p1007_p13 }
  0x25   : > { %910 = vmatmul.mubr.msk.f32.gmra.mrb[2].mxu1 %vm236_vm0, %v215_v27 }
  0x26   : > { %912 = vmatprep.mubr.msk.f32.mxu1 %vm236_vm0, %v216_v28  ;;  %870 = vmatmul.mubr.msk.f32.gmra.mrb[2].mxu0 %vm236_vm0, %v215_v27 }
  0x27   : > { %872 = vmatprep.mubr.msk.f32.mxu0 %vm236_vm0, %v216_v28 }
  0x29   : > { %913 = vmatmul.mubr.msk.f32.gmra.mrb[4].mxu1 %vm236_vm0, %v217_v29 }
  0x2a   : > { %915 = vmatprep.mubr.msk.f32.mxu1 %vm236_vm0, %v218_v30  ;;  %873 = vmatmul.mubr.msk.f32.gmra.mrb[4].mxu0 %vm236_vm0, %v217_v29 }
  0x2b   : > { %875 = vmatprep.mubr.msk.f32.mxu0 %vm236_vm0, %v218_v30 }
  0x2d   : > { %916 = vmatmul.mubr.msk.f32.gmra.mrb[6].mxu1 %vm236_vm0, %v219_v31 }
  0x2e   : > { %918 = vmatprep.mubr.msk.f32.mxu1 %vm236_vm0, %v220_v32  ;;  %876 = vmatmul.mubr.msk.f32.gmra.mrb[6].mxu0 %vm236_vm0, %v219_v31 }
  0x2f   : > { %878 = vmatprep.mubr.msk.f32.mxu0 %vm236_vm0, %v220_v32 }
  0x31   : > { %919 = vmatmul.mubr.msk.f32.gmra.mrb[8].mxu1 %vm236_vm0, %v221_v33 }
  0x32   : > { %921 = vmatprep.mubr.msk.f32.mxu1 %vm236_vm0, %v222_v34  ;;  %879 = vmatmul.mubr.msk.f32.gmra.mrb[8].mxu0 %vm236_vm0, %v221_v33 }
  0x33   : > { %881 = vmatprep.mubr.msk.f32.mxu0 %vm236_vm0, %v222_v34 }
  0x35   : > { %922 = vmatmul.mubr.msk.f32.gmra.mrb[10].mxu1 %vm236_vm0, %v223_v35 }
  0x36   : > { %924 = vmatprep.mubr.msk.f32.mxu1 %vm236_vm0, %v224_v36  ;;  %882 = vmatmul.mubr.msk.f32.gmra.mrb[10].mxu0 %vm236_vm0, %v223_v35 }
  0x37   : > { %884 = vmatprep.mubr.msk.f32.mxu0 %vm236_vm0, %v224_v36 }
  0x39   : > { %925 = vmatmul.mubr.msk.f32.gmra.mrb[12].mxu1 %vm236_vm0, %v225_v37 }
  0x3a   : > { %927 = vmatprep.mubr.msk.f32.mxu1 %vm236_vm0, %v226_v38  ;;  %885 = vmatmul.mubr.msk.f32.gmra.mrb[12].mxu0 %vm236_vm0, %v225_v37 }
  0x3b   : > { %887 = vmatprep.mubr.msk.f32.mxu0 %vm236_vm0, %v226_v38 }
  0x3d   : > { %928 = vmatmul.mubr.msk.f32.gmra.mrb[14].mxu1 %vm236_vm0, %v227_v39 }
  0x3e   : > { %888 = vmatmul.mubr.msk.f32.gmra.mrb[14].mxu0 %vm236_vm0, %v227_v39 }
  0xf4   : > { %v908_v40 = vpop.f32.mrb[0].mxu1 }
  0xf5   : > { %v521_v41 = vpop.f32.mrb[1].mxu1  ;;  %v868_v56 = vpop.f32.mrb[0].mxu0 }
  0xf6   : > { %600 = vxpose.xlu0.b32.start [1/16] %v521_v41, 128  ;;  %432 = vst.msk [vmem:[%s1257_s9 + $0x8] sm:$0xff] %vm430_vm1, %v868_v56  ;;  %v351_v57 = vpop.f32.mrb[1].mxu0 }
  0xf7   : > { %431 = vst.msk [vmem:[%s1257_s9] sm:$0xff] %vm430_vm1, %v351_v57 }
  0xf8   : > { %v911_v42 = vpop.f32.mrb[2].mxu1 }
  0xf9   : > { %v531_v43 = vpop.f32.mrb[3].mxu1  ;;  %v871_v58 = vpop.f32.mrb[2].mxu0 }
  0xfa   : > { %601 = vxpose.xlu0.b32.cont [2/16] %v908_v40, 128  ;;  %434 = vst.msk [vmem:[%s1257_s9 + $0x18] sm:$0xff] %vm430_vm1, %v871_v58  ;;  %v361_v59 = vpop.f32.mrb[3].mxu0 }
  0xfb   : > { %433 = vst.msk [vmem:[%s1257_s9 + $0x10] sm:$0xff] %vm430_vm1, %v361_v59 }
  0xfc   : > { %v914_v44 = vpop.f32.mrb[4].mxu1 }
  0xfd   : > { %v541_v45 = vpop.f32.mrb[5].mxu1  ;;  %v874_v60 = vpop.f32.mrb[4].mxu0 }
  0xfe   : > { %602 = vxpose.xlu0.b32.cont [3/16] %v531_v43, 128  ;;  %436 = vst.msk [vmem:[%s1257_s9 + $0x28] sm:$0xff] %vm430_vm1, %v874_v60  ;;  %v371_v61 = vpop.f32.mrb[5].mxu0 }
  0xff   : > { %435 = vst.msk [vmem:[%s1257_s9 + $0x20] sm:$0xff] %vm430_vm1, %v371_v61 }
 0x100   : > { %v917_v46 = vpop.f32.mrb[6].mxu1 }
 0x101   : > { %v551_v47 = vpop.f32.mrb[7].mxu1  ;;  %v877_v62 = vpop.f32.mrb[6].mxu0 }
 0x102   : > { %603 = vxpose.xlu0.b32.cont [4/16] %v911_v42, 128  ;;  %438 = vst.msk [vmem:[%s1257_s9 + $0x38] sm:$0xff] %vm430_vm1, %v877_v62  ;;  %v381_v63 = vpop.f32.mrb[7].mxu0 }
 0x103   : > { %437 = vst.msk [vmem:[%s1257_s9 + $0x30] sm:$0xff] %vm430_vm1, %v381_v63 }
 0x104   : > { %v920_v48 = vpop.f32.mrb[8].mxu1 }
 0x105   : > { %v561_v49 = vpop.f32.mrb[9].mxu1  ;;  %v880_v0 = vpop.f32.mrb[8].mxu0 }
 0x106   : > { %604 = vxpose.xlu0.b32.cont [5/16] %v541_v45, 128  ;;  %440 = vst.msk [vmem:[%s1257_s9 + $0x48] sm:$0xff] %vm430_vm1, %v880_v0  ;;  %v391_v1 = vpop.f32.mrb[9].mxu0 }
 0x107   : > { %439 = vst.msk [vmem:[%s1257_s9 + $0x40] sm:$0xff] %vm430_vm1, %v391_v1 }
 0x108   : > { %v923_v50 = vpop.f32.mrb[10].mxu1 }
 0x109   : > { %v571_v51 = vpop.f32.mrb[11].mxu1  ;;  %v883_v2 = vpop.f32.mrb[10].mxu0 }
 0x10a   : > { %605 = vxpose.xlu0.b32.cont [6/16] %v914_v44, 128  ;;  %442 = vst.msk [vmem:[%s1257_s9 + $0x58] sm:$0xff] %vm430_vm1, %v883_v2  ;;  %v401_v3 = vpop.f32.mrb[11].mxu0 }
 0x10b   : > { %441 = vst.msk [vmem:[%s1257_s9 + $0x50] sm:$0xff] %vm430_vm1, %v401_v3 }
 0x10c   : > { %v926_v52 = vpop.f32.mrb[12].mxu1 }
 0x10d   : > { %v581_v53 = vpop.f32.mrb[13].mxu1  ;;  %v886_v4 = vpop.f32.mrb[12].mxu0 }
 0x10e   : > { %606 = vxpose.xlu0.b32.cont [7/16] %v551_v47, 128  ;;  %444 = vst.msk [vmem:[%s1257_s9 + $0x68] sm:$0xff] %vm430_vm1, %v886_v4  ;;  %v411_v5 = vpop.f32.mrb[13].mxu0 }
 0x10f   : > { %443 = vst.msk [vmem:[%s1257_s9 + $0x60] sm:$0xff] %vm430_vm1, %v411_v5 }
 0x110   : > { %v929_v54 = vpop.f32.mrb[14].mxu1 }
 0x111   : > { %v591_v55 = vpop.f32.mrb[15].mxu1  ;;  %v889_v6 = vpop.f32.mrb[14].mxu0 }
 0x112   : > { %607 = vxpose.xlu0.b32.cont [8/16] %v917_v46, 128  ;;  %446 = vst.msk [vmem:[%s1257_s9 + $0x78] sm:$0xff] %vm430_vm1, %v889_v6  ;;  %v421_v7 = vpop.f32.mrb[15].mxu0 }
 0x113   : > { %445 = vst.msk [vmem:[%s1257_s9 + $0x70] sm:$0xff] %vm430_vm1, %v421_v7 }
 0x116   : > { %608 = vxpose.xlu0.b32.cont [9/16] %v561_v49, 128 }
 0x11a   : > { %609 = vxpose.xlu0.b32.cont [10/16] %v920_v48, 128 }
 0x11e   : > { %610 = vxpose.xlu0.b32.cont [11/16] %v571_v51, 128 }
 0x122   : > { %611 = vxpose.xlu0.b32.cont [12/16] %v923_v50, 128 }
 0x126   : > { %612 = vxpose.xlu0.b32.cont [13/16] %v581_v53, 128 }
 0x12a   : > { %613 = vxpose.xlu0.b32.cont [14/16] %v926_v52, 128 }
 0x12e   : > { %614 = vxpose.xlu0.b32.cont [15/16] %v591_v55, 128 }
 0x132   : > { %615 = vxpose.xlu0.b32.end [16/16] %v929_v54, 128 }
 0x176   : > { %v616_v8 = vpop.trf.xlu0 }
 0x177   : > { %632 = vst [vmem:[%s1294_s10] sm:$0xff] %v616_v8 }
 0x17a   : > { %v617_v9 = vpop.trf.xlu0 }
 0x17b   : > { %633 = vst [vmem:[%s1294_s10 + $0x8] sm:$0xff] %v617_v9 }
 0x17e   : > { %v618_v10 = vpop.trf.xlu0 }
 0x17f   : > { %634 = vst [vmem:[%s1294_s10 + $0x10] sm:$0xff] %v618_v10 }
 0x182   : > { %v619_v11 = vpop.trf.xlu0 }
 0x183   : > { %635 = vst [vmem:[%s1294_s10 + $0x18] sm:$0xff] %v619_v11 }
 0x186   : > { %v620_v12 = vpop.trf.xlu0 }
 0x187   : > { %636 = vst [vmem:[%s1294_s10 + $0x20] sm:$0xff] %v620_v12 }
 0x18a   : > { %v621_v13 = vpop.trf.xlu0 }
 0x18b   : > { %637 = vst [vmem:[%s1294_s10 + $0x28] sm:$0xff] %v621_v13 }
 0x18e   : > { %v622_v14 = vpop.trf.xlu0 }
 0x18f   : > { %638 = vst [vmem:[%s1294_s10 + $0x30] sm:$0xff] %v622_v14 }
 0x192   : > { %v623_v15 = vpop.trf.xlu0 }
 0x193   : > { %639 = vst [vmem:[%s1294_s10 + $0x38] sm:$0xff] %v623_v15 }
 0x196   : > { %v624_v16 = vpop.trf.xlu0 }
 0x197   : > { %640 = vst [vmem:[%s1294_s10 + $0x40] sm:$0xff] %v624_v16 }
 0x19a   : > { %v625_v17 = vpop.trf.xlu0 }
 0x19b   : > { %641 = vst [vmem:[%s1294_s10 + $0x48] sm:$0xff] %v625_v17 }
 0x19e   : > { %v626_v18 = vpop.trf.xlu0 }
 0x19f   : > { %642 = vst [vmem:[%s1294_s10 + $0x50] sm:$0xff] %v626_v18 }
 0x1a2   : > { %v627_v19 = vpop.trf.xlu0 }
 0x1a3   : > { %643 = vst [vmem:[%s1294_s10 + $0x58] sm:$0xff] %v627_v19 }
 0x1a6   : > { %v628_v20 = vpop.trf.xlu0 }
 0x1a7   : > { %644 = vst [vmem:[%s1294_s10 + $0x60] sm:$0xff] %v628_v20 }
 0x1aa   : > { %v629_v21 = vpop.trf.xlu0 }
 0x1ab   : > { %645 = vst [vmem:[%s1294_s10 + $0x68] sm:$0xff] %v629_v21 }
 0x1ae   : > { %v630_v22 = vpop.trf.xlu0 }
 0x1af   : > { %646 = vst [vmem:[%s1294_s10 + $0x70] sm:$0xff] %v630_v22 }
 0x1b2   : > { %v631_v23 = vpop.trf.xlu0 }
 0x1b3   : > { %647 = vst [vmem:[%s1294_s10 + $0x78] sm:$0xff] %v631_v23 }
 0x1b4   : > { %1017 = shalt.err (!%p1014_p3)
}
 0x1b5   : > { %s1018_s29 = scalar_lea.hbm %s1316_s20, 2048  ;;  %s1022_s8 = scalar_lea.hbm %s1368_s4, 8192 }
 0x1b6   : > { %p1019_p4 = scmp.ne.s32.totalorder %s1316_s20, %s1018_s29  ;;  %p1023_p9 = scmp.lt.u32.totalorder %s1316_s20, %s1368_s4 }
 0x1b7   : > { %p1024_p10 = scmp.lt.u32.totalorder %s1022_s8, %s1018_s29  ;;  %p1026_p12 = scmp.lt.u32.totalorder %s1018_s29, %s1316_s20 }
 0x1b8   : > { %p1020_p7 = pnand %p1019_p4, %p1135_p5 }
 0x1b9   : > { %p1025_p11 = por %p1024_p10, %p1023_p9 }
 0x1ba   : > { %p1021_p8 = pneg %p1020_p7 }
 0x1bb   : > { %p1027_p13 = por %p1026_p12, %p1025_p11 }
 0x1bd   : > { %p1028_p0 = pnand %p1027_p13, %p1021_p8 }
 0x1bf   : > { %1031 = shalt.err (!%p1028_p0)
}
 0x1c0   : > { %s1069_s5 = smov 128   ;;  %s1070_s10 = smov 512  }
 0x1c1   : > { %s1071_s11 = smov 8  }
 0x1c2   : > { %962 = dma.vmem_to_hbm [thread:$0]  (%p1135_p5), %s1318_s12, 2048, %s1316_s20, %s1323_s22, %s1069_s5, %s1070_s10, %s1071_s11  }
 0x1c3 PF: > { %p968_p1 = scmp.ge.s32.totalorder %s1066_s18, 2  ;;  %s693_s13 = sand.u32 1, %s1054_s15  }
 0x1c4   : > { %s694_s14 = scalar_lea.sflag [#allocation3], %s693_s13 }
 0x1c5   : > { %p965_p2 = pnand %p968_p1, %p1139_p6 }
 0x1c7   : > { %1049 = dma.done.wait (!%p965_p2), %s694_s14, 2048  }
 0x1c8   : > { %1051 = vsyncadd (!%p965_p2), %s694_s14, 4294965248  ;;  %p15_p3 = scmp.ge.s32.totalorder %s1122_s21, 6   ;;  %s1371_s15 = smov %s1058_s16 }
 0x1c9   : > { %s1372_s16 = smov %s1062_s17  ;;  %s1373_s17 = smov %s1133_s24 }
 0x1ca   : > { %s1374_s18 = smov %s1122_s21  ;;  %17 = sbr.rel (!%p15_p3) target bundleno = 3 (0x3), region = 79 }
 0x1d1   :  { %699 = vsyncpa [#allocation3], 1 }
 0x1d2   :  { %701 = vsyncpa [#allocation3 + $0x1], 1 }

</bundles_post_ra>
